<compile_context>
chip_gen: v6e
topology: v6e:2x2x1
jax: 0.10.0
libtpu: 0.0.40
codegen_flags: <defaults>
</compile_context>

<pallas_src>
import functools
import math

import jax
import jax.numpy as jnp
from jax.experimental import pallas as pl
from jax.experimental.pallas import tpu as pltpu


def _round_up(x, m):
    return (x + m - 1) // m * m


def timestep_embedding(t, dim, max_period=10000):
    """Pure-JAX sinusoidal embedding, matching the PyTorch staticmethod (reference)."""
    half = dim // 2
    freqs = jnp.exp(
        -math.log(max_period) * jnp.arange(half, dtype=jnp.float32) / half
    )
    args = t.astype(jnp.float32)[:, None] * freqs[None, :]
    emb = jnp.concatenate([jnp.cos(args), jnp.sin(args)], axis=-1)
    if dim % 2:
        emb = jnp.concatenate([emb, jnp.zeros_like(emb[:, :1])], axis=-1)
    return emb


def timestep_embedder_kernel(t_ref, freqs_ref, w1_ref, b1_ref, w2_ref, b2_ref,
                             o_ref, *, half):
    # t_ref    : (TM, 1)      f32   raw timesteps (row tile)
    # freqs_ref: (1, Fpad)    f32   freqs repeated (cos half | sin half), 0-padded
    # w1_ref   : (Fpad, Hpad) bf16  fc1 weight, stored (in, out), zero-padded
    # b1_ref   : (1, Hpad)    f32
    # w2_ref   : (Hpad, Hpad) bf16  fc2 weight, stored (in, out), zero-padded
    # b2_ref   : (1, Hpad)    f32
    # o_ref    : (TM, Hpad)   out dtype (bf16 default), lane-dense
    #
    # Fused sinusoidal embedding (EUP transcendentals).  Padded freq columns
    # are zero -> sin(0) = 0 there, and the matching w1 rows are zero anyway.
    args = t_ref[...] * freqs_ref[...]                          # (TM, Fpad) f32
    col = jax.lax.broadcasted_iota(jnp.int32, args.shape, 1)
    emb = jnp.where(col < half, jnp.cos(args), jnp.sin(args))   # (TM, Fpad) f32

    z = (
        jnp.dot(emb.astype(jnp.bfloat16), w1_ref[...],
                preferred_element_type=jnp.float32)
        + b1_ref[...]
    )
    # SiLU in f32: x * sigmoid(x) = x * 1/(1 + exp(-x)); exp + approx
    # reciprocal both sit on the EUP slot, VPU only does mul/add.
    h = z * pl.reciprocal(1.0 + jnp.exp(-z), approx=True)
    y = (
        jnp.dot(h.astype(jnp.bfloat16), w2_ref[...],
                preferred_element_type=jnp.float32)
        + b2_ref[...]
    )
    o_ref[...] = y.astype(o_ref.dtype)


def timestep_embedder_forward(t, params, hidden_size,
                              frequency_embedding_size=256,
                              max_period=10000,
                              out_dtype=jnp.bfloat16):
    """t: (N,) float timesteps.  Returns (N, hidden_size) in `out_dtype`."""
    N = t.shape[0]
    F = frequency_embedding_size
    Fpad, Hpad = params["w1"].shape
    half = F // 2

    # Grid-invariant freqs row: freqs repeated for the cos and sin halves,
    # zero in any padded / odd-dim columns.  Constant-folded under jit.
    freqs = jnp.exp(
        -math.log(max_period) * jnp.arange(half, dtype=jnp.float32) / half
    )
    freqs_row = (
        jnp.zeros((1, Fpad), jnp.float32)
        .at[0, : 2 * half]
        .set(jnp.concatenate([freqs, freqs]))
    )

    # Row tiling: tiles of up to 512 rows, rounded to a multiple of 16 (bf16
    # sublane packing).  Batches larger than 512 split into >=2 tiles so the
    # "parallel" grid axis can land on both v7x TensorCores.
    n_min = _round_up(max(N, 16), 16)
    num_tiles = -(-n_min // 512)
    TM = _round_up(-(-n_min // num_tiles), 16)
    Npad = num_tiles * TM

    t_col = t.astype(jnp.float32).reshape(N, 1)
    if Npad != N:
        # Tiny pad (4 B/row); padded rows produce garbage that is sliced off.
        t_col = jnp.pad(t_col, ((0, Npad - N), (0, 0)))

    out = pl.pallas_call(
        functools.partial(timestep_embedder_kernel, half=half),
        out_shape=jax.ShapeDtypeStruct((Npad, Hpad), out_dtype),
        grid_spec=pltpu.PrefetchScalarGridSpec(
            num_scalar_prefetch=0,
            grid=(num_tiles,),
            in_specs=[
                pl.BlockSpec((TM, 1), lambda i: (i, 0)),       # timesteps (row tile)
                pl.BlockSpec((1, Fpad), lambda i: (0, 0)),     # freqs (grid-invariant)
                pl.BlockSpec((Fpad, Hpad), lambda i: (0, 0)),  # w1 (grid-invariant)
                pl.BlockSpec((1, Hpad), lambda i: (0, 0)),     # b1
                pl.BlockSpec((Hpad, Hpad), lambda i: (0, 0)),  # w2 (grid-invariant)
                pl.BlockSpec((1, Hpad), lambda i: (0, 0)),     # b2
            ],
            out_specs=pl.BlockSpec((TM, Hpad), lambda i: (i, 0)),
        ),
        compiler_params=pltpu.CompilerParams(
            dimension_semantics=("parallel",),
            vmem_limit_bytes=32 * 1024 * 1024,
        ),
    )(t_col, freqs_row, params["w1"], params["b1"], params["w2"], params["b2"])

    if Npad == N and Hpad == hidden_size:
        return out  # exact shape: no trailing slice copy (e.g. PixArt H=1152)
    return out[:N, :hidden_size]


def init_params(key, hidden_size, frequency_embedding_size=256):
    """Synthetic params matching nn.Linear shapes.

    Returns (kernel_params, raw_params):
      kernel_params: bf16 weights stored (in, out), zero-padded to lane-dense
                     shapes; f32 biases padded to (1, Hpad).
      raw_params:    un-padded f32 PyTorch-layout (out, in) weights / (out,)
                     biases for the pure-JAX reference.
    """
    F = frequency_embedding_size
    Fpad = _round_up(F, 128)
    Hpad = _round_up(hidden_size, 128)
    k = jax.random.split(key, 4)
    w1 = 0.02 * jax.random.normal(k[0], (hidden_size, F), jnp.float32)            # (out, in)
    b1 = 0.02 * jax.random.normal(k[1], (hidden_size,), jnp.float32)
    w2 = 0.02 * jax.random.normal(k[2], (hidden_size, hidden_size), jnp.float32)  # (out, in)
    b2 = 0.02 * jax.random.normal(k[3], (hidden_size,), jnp.float32)

    w1p = (
        jnp.zeros((Fpad, Hpad), jnp.float32).at[:F, :hidden_size].set(w1.T)
    ).astype(jnp.bfloat16)
    w2p = (
        jnp.zeros((Hpad, Hpad), jnp.float32).at[:hidden_size, :hidden_size].set(w2.T)
    ).astype(jnp.bfloat16)
    b1p = jnp.zeros((1, Hpad), jnp.float32).at[0, :hidden_size].set(b1)
    b2p = jnp.zeros((1, Hpad), jnp.float32).at[0, :hidden_size].set(b2)

    kernel_params = {"w1": w1p, "b1": b1p, "w2": w2p, "b2": b2p}
    raw_params = {"w1": w1, "b1": b1, "w2": w2, "b2": b2}
    return kernel_params, raw_params


def _reference_forward(t, raw, hidden_size, frequency_embedding_size=256,
                       out_dtype=jnp.bfloat16):
    """Pure-JAX reference with the same bf16-weight / f32-accumulate recipe."""
    emb = timestep_embedding(t, frequency_embedding_size).astype(jnp.bfloat16)
    w1 = raw["w1"].astype(jnp.bfloat16)   # (H, F)
    w2 = raw["w2"].astype(jnp.bfloat16)   # (H, H)
    z = jnp.dot(emb, w1.T, preferred_element_type=jnp.float32) + raw["b1"][None, :]
    h = z * jax.nn.sigmoid(z)
    y = (
        jnp.dot(h.astype(jnp.bfloat16), w2.T, preferred_element_type=jnp.float32)
        + raw["b2"][None, :]
    )
    return y.astype(out_dtype)


if __name__ == "__main__":
    # Small shapes consistent with the module: hidden_size=32,
    # frequency_embedding_size=256 (module default), batch of 8 timesteps.
    N, HID, FREQ = 8, 32, 256

    key = jax.random.PRNGKey(0)
    kt, kp = jax.random.split(key)
    t = jax.random.uniform(kt, (N,), jnp.float32, minval=0.0, maxval=1000.0)
    params, raw = init_params(kp, HID, FREQ)

    fwd = jax.jit(lambda tt, pp: timestep_embedder_forward(tt, pp, HID, FREQ))
    out = jax.block_until_ready(fwd(t, params))

    ref = _reference_forward(t, raw, HID, FREQ)
    assert out.shape == (N, HID), out.shape
    assert out.dtype == jnp.bfloat16, out.dtype
    err = float(jnp.max(jnp.abs(out.astype(jnp.float32) - ref.astype(jnp.float32))))
    assert err < 5e-3, err
    print("KERNEL_OK")
</pallas_src>

<mosaic_0001>
module attributes {stable_mosaic.version = 11 : i64} {
  func.func @timestep_embedder_kernel(%arg0: i32, %arg1: memref<16x1xf32, #tpu.memory_space<vmem>>, %arg2: memref<1x256xf32, #tpu.memory_space<vmem>>, %arg3: memref<256x128xbf16, #tpu.memory_space<vmem>>, %arg4: memref<1x128xf32, #tpu.memory_space<vmem>>, %arg5: memref<128x128xbf16, #tpu.memory_space<vmem>>, %arg6: memref<1x128xf32, #tpu.memory_space<vmem>>, %arg7: memref<16x128xbf16, #tpu.memory_space<vmem>>) attributes {dimension_semantics = [#tpu.dimension_semantics<parallel>], iteration_bounds = array<i64: 1>, scalar_prefetch = 0 : i64, scratch_operands = 0 : i64, tpu.core_type = #tpu.core_type<tc>, window_params = [{transform_indices = @transform_0, window_bounds = array<i64: 16, 1>}, {pipeline_mode = #tpu.pipeline_mode<synchronous>, transform_indices = @transform_1, window_bounds = array<i64: 1, 256>}, {pipeline_mode = #tpu.pipeline_mode<synchronous>, transform_indices = @transform_2, window_bounds = array<i64: 256, 128>}, {pipeline_mode = #tpu.pipeline_mode<synchronous>, transform_indices = @transform_3, window_bounds = array<i64: 1, 128>}, {pipeline_mode = #tpu.pipeline_mode<synchronous>, transform_indices = @transform_4, window_bounds = array<i64: 128, 128>}, {pipeline_mode = #tpu.pipeline_mode<synchronous>, transform_indices = @transform_5, window_bounds = array<i64: 1, 128>}, {transform_indices = @transform_6, window_bounds = array<i64: 16, 128>}]} {
    %c0 = arith.constant 0 : index
    %c0_0 = arith.constant 0 : index
    %0 = vector.load %arg1[%c0, %c0_0] : memref<16x1xf32, #tpu.memory_space<vmem>>, vector<16x1xf32>
    %c0_1 = arith.constant 0 : index
    %c0_2 = arith.constant 0 : index
    %1 = vector.load %arg2[%c0_1, %c0_2] : memref<1x256xf32, #tpu.memory_space<vmem>>, vector<1x256xf32>
    %2 = vector.broadcast %0 : vector<16x1xf32> to vector<16x256xf32>
    %3 = vector.broadcast %1 : vector<1x256xf32> to vector<16x256xf32>
    %4 = arith.mulf %2, %3 : vector<16x256xf32>
    %5 = tpu.iota {dimensions = array<i32: 1>} : vector<16x256xi32>
    %c128_i32 = arith.constant 128 : i32
    %6 = vector.broadcast %c128_i32 : i32 to vector<16x256xi32>
    %7 = arith.cmpi slt, %5, %6 : vector<16x256xi32>
    %8 = math.cos %4 : vector<16x256xf32>
    %9 = math.sin %4 : vector<16x256xf32>
    %10 = arith.select %7, %8, %9 : vector<16x256xi1>, vector<16x256xf32>
    %11 = arith.truncf %10 : vector<16x256xf32> to vector<16x256xbf16>
    %c0_3 = arith.constant 0 : index
    %c0_4 = arith.constant 0 : index
    %12 = vector.load %arg3[%c0_3, %c0_4] : memref<256x128xbf16, #tpu.memory_space<vmem>>, vector<256x128xbf16>
    %cst = arith.constant dense<0.000000e+00> : vector<16x128xf32>
    %13 = tpu.matmul %11, %12, %cst {dimension_numbers = #tpu.dot_dimension_numbers<[1], [0], [0], [1], [0, 0, 1, 1], [], []>} : vector<16x256xbf16>, vector<256x128xbf16>, vector<16x128xf32> -> vector<16x128xf32>
    %c0_5 = arith.constant 0 : index
    %c0_6 = arith.constant 0 : index
    %14 = vector.load %arg4[%c0_5, %c0_6] : memref<1x128xf32, #tpu.memory_space<vmem>>, vector<1x128xf32>
    %15 = vector.broadcast %14 : vector<1x128xf32> to vector<16x128xf32>
    %16 = arith.addf %13, %15 : vector<16x128xf32>
    %cst_7 = arith.constant 0.000000e+00 : f32
    %17 = vector.broadcast %cst_7 : f32 to vector<16x128xf32>
    %18 = arith.subf %17, %16 : vector<16x128xf32>
    %19 = math.exp %18 : vector<16x128xf32>
    %cst_8 = arith.constant 1.000000e+00 : f32
    %20 = vector.broadcast %cst_8 : f32 to vector<16x128xf32>
    %21 = arith.addf %20, %19 : vector<16x128xf32>
    %22 = tpu.reciprocal %21 {approx = true} : vector<16x128xf32> -> vector<16x128xf32>
    %23 = arith.mulf %16, %22 : vector<16x128xf32>
    %24 = arith.truncf %23 : vector<16x128xf32> to vector<16x128xbf16>
    %c0_9 = arith.constant 0 : index
    %c0_10 = arith.constant 0 : index
    %25 = vector.load %arg5[%c0_9, %c0_10] : memref<128x128xbf16, #tpu.memory_space<vmem>>, vector<128x128xbf16>
    %cst_11 = arith.constant dense<0.000000e+00> : vector<16x128xf32>
    %26 = tpu.matmul %24, %25, %cst_11 {dimension_numbers = #tpu.dot_dimension_numbers<[1], [0], [0], [1], [0, 0, 1, 1], [], []>} : vector<16x128xbf16>, vector<128x128xbf16>, vector<16x128xf32> -> vector<16x128xf32>
    %c0_12 = arith.constant 0 : index
    %c0_13 = arith.constant 0 : index
    %27 = vector.load %arg6[%c0_12, %c0_13] : memref<1x128xf32, #tpu.memory_space<vmem>>, vector<1x128xf32>
    %28 = vector.broadcast %27 : vector<1x128xf32> to vector<16x128xf32>
    %29 = arith.addf %26, %28 : vector<16x128xf32>
    %30 = arith.truncf %29 : vector<16x128xf32> to vector<16x128xbf16>
    %c0_14 = arith.constant 0 : index
    %c0_15 = arith.constant 0 : index
    %31 = vector.load %arg7[%c0_14, %c0_15] : memref<16x128xbf16, #tpu.memory_space<vmem>>, vector<16x128xbf16>
    tpu.vector_store %arg7[%c0_14, %c0_15], %30 {strides = array<i32>} : memref<16x128xbf16, #tpu.memory_space<vmem>>, vector<16x128xbf16>,
    return
  }
  func.func @transform_0(%arg0: i32) -> (i32, i32) {
    %c0_i32 = arith.constant 0 : i32
    %c0_i32_0 = arith.constant 0 : i32
    return %arg0, %c0_i32 : i32, i32
  }
  func.func @transform_1(%arg0: i32) -> (i32, i32) {
    %c0_i32 = arith.constant 0 : i32
    %c0_i32_0 = arith.constant 0 : i32
    %c0_i32_1 = arith.constant 0 : i32
    return %c0_i32, %c0_i32_0 : i32, i32
  }
  func.func @transform_2(%arg0: i32) -> (i32, i32) {
    %c0_i32 = arith.constant 0 : i32
    %c0_i32_0 = arith.constant 0 : i32
    %c0_i32_1 = arith.constant 0 : i32
    return %c0_i32, %c0_i32_0 : i32, i32
  }
  func.func @transform_3(%arg0: i32) -> (i32, i32) {
    %c0_i32 = arith.constant 0 : i32
    %c0_i32_0 = arith.constant 0 : i32
    %c0_i32_1 = arith.constant 0 : i32
    return %c0_i32, %c0_i32_0 : i32, i32
  }
  func.func @transform_4(%arg0: i32) -> (i32, i32) {
    %c0_i32 = arith.constant 0 : i32
    %c0_i32_0 = arith.constant 0 : i32
    %c0_i32_1 = arith.constant 0 : i32
    return %c0_i32, %c0_i32_0 : i32, i32
  }
  func.func @transform_5(%arg0: i32) -> (i32, i32) {
    %c0_i32 = arith.constant 0 : i32
    %c0_i32_0 = arith.constant 0 : i32
    %c0_i32_1 = arith.constant 0 : i32
    return %c0_i32, %c0_i32_0 : i32, i32
  }
  func.func @transform_6(%arg0: i32) -> (i32, i32) {
    %c0_i32 = arith.constant 0 : i32
    %c0_i32_0 = arith.constant 0 : i32
    return %arg0, %c0_i32 : i32, i32
  }
}

</mosaic_0001>

<bundles_post_ra>
// kernel: _lambda_.1
= control target key start
LH: loop header
LB: loop body
LE: loop exit
PB: predicated region body
PF: predicated region fallthrough
CT: control target
= control target key end

     0   :  { %11 = vsyncpa [#allocation3], 0  ;;  %s1869_s0 = inlined_call_operand.vmem [shape: f32[16,1], index: 0, kind: input, shape index: {}]   ;;  %s1870_s1 = inlined_call_operand.vmem [shape: f32[1,256], index: 1, kind: input, shape index: {}]   ;;  %s1871_s2 = inlined_call_operand.hbm [shape: bf16[256,128], index: 2, kind: input, shape index: {}]   ;;  %s1872_s3 = inlined_call_operand.vmem [shape: f32[1,128], index: 3, kind: input, shape index: {}]   ;;  %s1873_s4 = inlined_call_operand.hbm [shape: bf16[128,128], index: 4, kind: input, shape index: {}]   ;;  %s1874_s5 = inlined_call_operand.vmem [shape: f32[1,128], index: 5, kind: input, shape index: {}]   ;;  %s1875_s6 = inlined_call_operand.vmem [shape: bf16[16,128], index: 6, kind: output, shape index: {}]  }
   0x1   :  { %12 = vsyncpa [#allocation5], 0  ;;  %s1476_s21 = smov [#allocation2]  }
   0x2   :  { %s22_s22 = sshll.u32 %s1476_s21, 4  ;;  %s23_s22 = int_to_ptr.vmem [resolvable:$true] %s22_s22 }
   0x3   :  { %s1440_s23 = scalar_lea.vmem %s23_s22, 2048  ;;  %p1445_p1 = scmp.lt.s32.totalorder %s23_s22, %s23_s22 }
   0x4   :  { %p1441_p0 = scmp.ne.s32.totalorder %s23_s22, %s1440_s23  ;;  %p1446_p2 = scmp.lt.s32.totalorder %s1440_s23, %s1440_s23 }
   0x6   :  { %p1447_p3 = por %p1446_p2, %p1445_p1 }
   0x8   :  { %p1448_p4 = pnand %p1447_p3, %p1441_p0 }
   0xa   :  { %1451 = shalt.err (!%p1448_p4)
}
   0xb   :  { %s1477_s24 = smov 64   ;;  %s1478_s25 = smov 4  }
   0xc   :  { %28 = dma.hbm_to_vmem [thread:$0]  %s1871_s2, 2048, %s23_s22, [#allocation3], %s1477_s24, %s1477_s24, %s1478_s25  }
   0xd   :  { %s1479_s28 = smov [#allocation4]  }
   0xe   :  { %s36_s29 = sshll.u32 %s1479_s28, 4  ;;  %s37_s29 = int_to_ptr.vmem [resolvable:$true] %s36_s29 }
   0xf   :  { %s1460_s30 = scalar_lea.vmem %s37_s29, 1024  ;;  %p1465_p6 = scmp.lt.s32.totalorder %s37_s29, %s37_s29 }
  0x10   :  { %p1461_p5 = scmp.ne.s32.totalorder %s37_s29, %s1460_s30  ;;  %p1466_p7 = scmp.lt.s32.totalorder %s1460_s30, %s1460_s30 }
  0x12   :  { %p1467_p8 = por %p1466_p7, %p1465_p6 }
  0x14   :  { %p1468_p9 = pnand %p1467_p8, %p1461_p5 }
  0x16   :  { %1471 = shalt.err (!%p1468_p9)
}
  0x17   :  { %42 = dma.hbm_to_vmem [thread:$0]  %s1873_s4, 1024, %s37_s29, [#allocation5], %s1477_s24, %s1477_s24, %s1478_s25  }
  0x18   :  { %1472 = dma.done.wait [#allocation3], 2048  }
  0x19   :  { %1473 = vsyncadd [#allocation3], 4294965248 }
  0x1a   :  { %1474 = dma.done.wait [#allocation5], 1024  }
  0x1b   :  { %1475 = vsyncadd [#allocation5], 4294966272  ;;  %v1480_v0 = vmov 0   ;;  %v52_v1 = vld [vmem:[%s1869_s0] sm:$0xff]  ;;  %v53_v2 = vld [vmem:[%s1869_s0 + $0x8] sm:$0xff]  ;;  %v66_v19 = vlaneseq }
  0x1c   :  { %1383 = vset.pattern.permute.xlu0 %v1480_v0  ;;  %v1384_v3 = vld [vmem:[#allocation2 + $0x78] sm:$0xff]   ;;  %v1386_v5 = vld [vmem:[#allocation2 + $0x70] sm:$0xff]   ;;  %v1388_v7 = vld [vmem:[#allocation2 + $0x68] sm:$0xff]   ;;  %v1481_v58 = vmov 683565275  }
  0x1d   :  { %57 = vperm.xlu0 %1383, %v52_v1   ;;  %v1385_v4 = vld [vmem:[#allocation2 + $0x38] sm:$0xff]   ;;  %1303 = vmatprep.subr.bf16.mxu0 %v1384_v3  ;;  %v1387_v6 = vld [vmem:[#allocation2 + $0x30] sm:$0xff]   ;;  %v1389_v8 = vld [vmem:[#allocation2 + $0x28] sm:$0xff]   ;;  %v67_v20 = vshrl.u32 %v66_v19, 7  ;;  %v1482_v60 = vmov 2475754826  }
  0x1e   :  { %1304 = vmatpush3.bf16.msra.mxu0 %v1385_v4  ;;  %v1390_v9 = vld [vmem:[#allocation2 + $0x60] sm:$0xff]   ;;  %v1392_v11 = vld [vmem:[#allocation2 + $0x58] sm:$0xff]   ;;  %v1394_v13 = vld [vmem:[#allocation2 + $0x50] sm:$0xff]   ;;  %v1483_v0 = vmov 2131351028  }
  0x1f   :  { %1305 = vmatprep.subr.bf16.mxu0 %v1386_v5  ;;  %v1391_v10 = vld [vmem:[#allocation2 + $0x20] sm:$0xff]   ;;  %v1393_v12 = vld [vmem:[#allocation2 + $0x18] sm:$0xff]   ;;  %v1395_v14 = vld [vmem:[#allocation2 + $0x10] sm:$0xff]   ;;  %v68_v21 = vsub.s32 0, %v67_v20  ;;  %v72_v22 = vsub.s32 1, %v67_v20 }
  0x20   :  { %v1396_v15 = vld [vmem:[#allocation2 + $0x48] sm:$0xff]   ;;  %v1398_v17 = vld [vmem:[#allocation2 + $0x40] sm:$0xff]   ;;  %v1484_v3 = vmov 2102212464  }
  0x21   :  { %62 = vperm.xlu0 %1383, %v53_v2   ;;  %v1397_v16 = vld [vmem:[#allocation2 + $0x8] sm:$0xff]   ;;  %v1399_v18 = vld [vmem:[#allocation2] sm:$0xff]  }
  0x22   :  { %1306 = vmatpush3.bf16.msra.mxu0 %v1387_v6  ;;  %v54_v23 = vld [vmem:[%s1870_s1] sm:$0x3]  ;;  %v1485_v6 = vmov 920167782  }
  0x23   :  { %1307 = vmatprep.subr.bf16.mxu0 %v1388_v7  ;;  %v69_v24 = vrot.slane %v54_v23, %v68_v21  ;;  %v73_v25 = vrot.slane %v54_v23, %v72_v22 }
  0x26   :  { %1308 = vmatpush3.bf16.msra.mxu0 %v1389_v8 }
  0x27   :  { %1309 = vmatprep.subr.bf16.mxu0 %v1390_v9  ;;  %v1486_v9 = vmov 1326507024  }
  0x2a   :  { %1310 = vmatpush3.bf16.msra.mxu0 %v1391_v10 }
  0x2b   :  { %1311 = vmatprep.subr.bf16.mxu0 %v1392_v11 }
  0x2e   :  { %1312 = vmatpush3.bf16.msra.mxu0 %v1393_v12 }
  0x2f   :  { %1313 = vmatprep.subr.bf16.mxu0 %v1394_v13 }
  0x32   :  { %1314 = vmatpush3.bf16.msra.mxu0 %v1395_v14 }
  0x33   :  { %1315 = vmatprep.subr.bf16.mxu0 %v1396_v15 }
  0x36   :  { %1316 = vmatpush3.bf16.msra.mxu0 %v1397_v16 }
  0x37   :  { %1317 = vmatprep.subr.bf16.mxu0 %v1398_v17 }
  0x3a   :  { %1318 = vmatpush3.bf16.msra.mxu0 %v1399_v18 }
  0x98   :  { %v58_v26 = vpop.permute.xlu0 %57 }
  0x99   :  { %v1539_v27 = vmul.f32 %v69_v24, %v58_v26  ;;  %v1541_v28 = vmul.f32 %v73_v25, %v58_v26 }
  0x9b   :  { %v85_v29 = vand.u32 2147483647, %v1539_v27  ;;  %v88_v30 = vand.u32 2139095040, %v1539_v27  ;;  %v604_v31 = vand.u32 2139095040, %v1541_v28  ;;  %v601_v52 = vand.u32 2147483647, %v1541_v28 }
  0x9c   :  { %v63_v32 = vpop.permute.xlu0 %62 }
  0x9d   :  { %v89_v33 = vshrl.u32 %v88_v30, 23  ;;  %v605_v34 = vshrl.u32 %v604_v31, 23  ;;  %v1546_v35 = vmul.f32 %v69_v24, %v63_v32  ;;  %v92_v36 = vand.u32 8388607, %v85_v29 }
  0x9e   :  { %v1550_v37 = vmul.f32 %v73_v25, %v63_v32 }
  0x9f   :  { %v1236_v38 = vadd.s32 4294967169, %v89_v33  ;;  %v1256_v39 = vadd.s32 4294967169, %v605_v34  ;;  %v291_v40 = vand.u32 2147483647, %v1546_v35  ;;  %v294_v41 = vand.u32 2139095040, %v1546_v35 }
  0xa0   :  { %v93_v44 = vor.u32 8388608, %v92_v36  ;;  %v812_v45 = vand.u32 2139095040, %v1550_v37 }
  0xa1   :  { %v95_v42 = vadd.s32 1, %v1236_v38  ;;  %v611_v43 = vadd.s32 1, %v1256_v39  ;;  %v295_v46 = vshrl.u32 %v294_v41, 23  ;;  %v1557_v47 = vand.u32 8388607, %v291_v40 }
  0xa2   :  { %v1561_v51 = vshll.u32 %v93_v44, 8  ;;  %v813_v56 = vshrl.u32 %v812_v45, 23  ;;  %v1593_v44 = vand.u32 8388607, %v601_v52 }
  0xa3   :  { %vm96_vm0 = vcmp.gt.s32.totalorder %v95_v42, 0  ;;  %vm612_vm1 = vcmp.gt.s32.totalorder %v611_v43, 0  ;;  %v1244_v54 = vadd.s32 4294967169, %v295_v46  ;;  %v299_v55 = vor.u32 8388608, %v1557_v47 }
  0xa4   :  { %v97_v48 = vsel %vm96_vm0, %v95_v42, 0  ;;  %v1559_v50 = vsel %vm612_vm1, %v611_v43, 0  ;;  %v1264_v20 = vadd.s32 4294967169, %v813_v56 }
  0xa5   :  { %v99_v49 = vand.u32 31, %v97_v48  ;;  %v98_v57 = vshrl.u32 %v97_v48, 5  ;;  %v1568_v62 = vand.u32 31, %v1559_v50  ;;  %v301_v14 = vadd.s32 1, %v1244_v54 }
  0xa6   :  { %v819_v41 = vadd.s32 1, %v1264_v20  ;;  %v1597_v47 = vshll.u32 %v299_v55, 8 }
  0xa7   :  { %v100_v53 = vsub.s32 32, %v99_v49  ;;  %v102_v59 = vshll.u32 %v1481_v58, %v99_v49  ;;  %v105_v61 = vshll.u32 %v1482_v60, %v99_v49  ;;  %v108_v2 = vshll.u32 %v1483_v0, %v99_v49 }
  0xa8   :  { %v111_v5 = vshll.u32 %v1484_v3, %v99_v49  ;;  %v114_v8 = vshll.u32 %v1485_v6, %v99_v49  ;;  %vm117_vm2 = vcmp.lt.s32.totalorder %v98_v57, 1  ;;  %vm120_vm3 = vcmp.lt.s32.totalorder %v98_v57, 4 }
  0xa9   :  { %v103_v63 = vshrl.u32 %v1482_v60, %v100_v53  ;;  %v106_v1 = vshrl.u32 %v1483_v0, %v100_v53  ;;  %v109_v4 = vshrl.u32 %v1484_v3, %v100_v53  ;;  %v112_v7 = vshrl.u32 %v1485_v6, %v100_v53 }
  0xaa   :  { %v115_v10 = vshrl.u32 %v1486_v9, %v100_v53  ;;  %v101_v21 = vshrl.u32 %v1481_v58, %v100_v53  ;;  %vm119_vm4 = vcmp.lt.s32.totalorder %v98_v57, 3  ;;  %vm118_vm5 = vcmp.lt.s32.totalorder %v98_v57, 2 }
  0xab   :  { %v104_v11 = vor.u32 %v103_v63, %v102_v59  ;;  %v107_v12 = vor.u32 %v106_v1, %v105_v61  ;;  %v110_v13 = vor.u32 %v109_v4, %v108_v2  ;;  %v113_v15 = vor.u32 %v112_v7, %v111_v5 }
  0xac   :  { %v116_v16 = vor.u32 %v115_v10, %v114_v8  ;;  %v1580_v26 = vsub.s32 32, %v1568_v62  ;;  %vm302_vm6 = vcmp.gt.s32.totalorder %v301_v14, 0  ;;  %v627_v45 = vshll.u32 %v1484_v3, %v1568_v62 }
  0xad   :  { %v122_v17 = vsel %vm120_vm3, %v110_v13, 2102212464  ;;  %v125_v18 = vsel %vm117_vm2, %v104_v11, %v107_v12  ;;  %v129_v19 = vsel %vm117_vm2, %v107_v12, %v110_v13  ;;  %v126_v22 = vsel %vm120_vm3, %v113_v15, 920167782 }
  0xae   :  { %v130_v23 = vsel %vm120_vm3, %v116_v16, 1326507024  ;;  %v127_v24 = vsel %vm119_vm4, %v110_v13, %v126_v22  ;;  %v121_v30 = vsel %vm117_vm2, %v101_v21, %v104_v11  ;;  %v123_v31 = vsel %vm119_vm4, %v107_v12, %v122_v17 }
  0xaf   :  { %v131_v25 = vsel %vm119_vm4, %v113_v15, %v130_v23  ;;  %v128_v32 = vsel %vm118_vm5, %v125_v18, %v127_v24  ;;  %v124_v42 = vsel %vm118_vm5, %v121_v30, %v123_v31  ;;  %v303_v43 = vsel %vm302_vm6, %v301_v14, 0 }
  0xb0   :  { %v132_v33 = vsel %vm118_vm5, %v129_v19, %v131_v25  ;;  %v1587_v38 = vmul.u32.u64.low %v1561_v51, %v128_v32  ;;  %v1588_v39 = vmul.u32.u64.high %v1561_v51, %v128_v32, %v1587_v38  ;;  %v305_v46 = vand.u32 31, %v303_v43 }
  0xb1   :  { %v1583_v34 = vmul.u32.u64.low %v1561_v51, %v132_v33  ;;  %v1584_v36 = vmul.u32.u64.high %v1561_v51, %v132_v33, %v1583_v34  ;;  %vm820_vm7 = vcmp.gt.s32.totalorder %v819_v41, 0  ;;  %v628_v49 = vshrl.u32 %v1485_v6, %v1580_v26 }
  0xb2   :  { %v143_v48 = vadd.s32 1, %v1588_v39  ;;  %v1606_v53 = vshrl.u32 %v1486_v9, %v1580_v26  ;;  %v140_v54 = vmul.u32 %v1561_v51, %v124_v42  ;;  %v304_v56 = vshrl.u32 %v303_v43, 5 }
  0xb3   :  { %vm142_vm8 = vc.u32 %v1584_v36, %v1587_v38  ;;  %v306_v57 = vsub.s32 32, %v305_v46  ;;  %v1609_v59 = vsel %vm820_vm7, %v819_v41, 0  ;;  %v308_v61 = vshll.u32 %v1481_v58, %v305_v46 }
  0xb4   :  { %v144_v55 = vsel %vm142_vm8, %v143_v48, %v1588_v39  ;;  %v311_v63 = vshll.u32 %v1482_v60, %v305_v46  ;;  %v314_v1 = vshll.u32 %v1483_v0, %v305_v46  ;;  %v317_v7 = vshll.u32 %v1484_v3, %v305_v46 }
  0xb5   :  { %v145_v2 = vadd.s32 %v144_v55, %v140_v54  ;;  %v309_v4 = vshrl.u32 %v1482_v60, %v306_v57  ;;  %v312_v5 = vshrl.u32 %v1483_v0, %v306_v57  ;;  %v315_v51 = vshrl.u32 %v1484_v3, %v306_v57 }
  0xb6   :  { %v318_v8 = vshrl.u32 %v1485_v6, %v306_v57  ;;  %v320_v10 = vshll.u32 %v1485_v6, %v305_v46  ;;  %v321_v11 = vshrl.u32 %v1486_v9, %v306_v57  ;;  %vm323_vm9 = vcmp.lt.s32.totalorder %v304_v56, 1 }
  0xb7   :  { %v146_v12 = vadd.s32 536870912, %v145_v2  ;;  %v310_v13 = vor.u32 %v309_v4, %v308_v61  ;;  %v313_v14 = vor.u32 %v312_v5, %v311_v63  ;;  %v307_v15 = vshrl.u32 %v1481_v58, %v306_v57 }
  0xb8   :  { %v316_v16 = vor.u32 %v315_v51, %v314_v1  ;;  %v319_v17 = vor.u32 %v318_v8, %v317_v7  ;;  %v322_v18 = vor.u32 %v321_v11, %v320_v10  ;;  %vm325_vm10 = vcmp.lt.s32.totalorder %v304_v56, 3 }
  0xb9   :  { %v1623_v19 = vshrl.u32 %v146_v12, 30  ;;  %vm326_vm11 = vcmp.lt.s32.totalorder %v304_v56, 4  ;;  %v331_v20 = vsel %vm323_vm9, %v310_v13, %v313_v14  ;;  %vm324_vm12 = vcmp.lt.s32.totalorder %v304_v56, 2 }
  0xba   :  { %v328_v21 = vsel %vm326_vm11, %v316_v16, 2102212464  ;;  %v332_v22 = vsel %vm326_vm11, %v319_v17, 920167782  ;;  %v335_v23 = vsel %vm323_vm9, %v313_v14, %v316_v16  ;;  %v336_v24 = vsel %vm326_vm11, %v322_v18, 1326507024 }
  0xbb   :  { %v148_v25 = vshll.u32 %v1623_v19, 30  ;;  %v333_v30 = vsel %vm325_vm10, %v316_v16, %v332_v22  ;;  %v337_v31 = vsel %vm325_vm10, %v319_v17, %v336_v24  ;;  %v630_v32 = vshll.u32 %v1485_v6, %v1568_v62 }
  0xbc   :  { %v327_v33 = vsel %vm323_vm9, %v307_v15, %v310_v13  ;;  %v334_v34 = vsel %vm324_vm12, %v331_v20, %v333_v30  ;;  %v338_v39 = vsel %vm324_vm12, %v335_v23, %v337_v31  ;;  %v329_v42 = vsel %vm325_vm10, %v313_v14, %v328_v21 }
  0xbd   :  { %v1635_v41 = vsub.s32 %v145_v2, %v148_v25  ;;  %v1639_v43 = vmul.u32.u64.low %v1597_v47, %v338_v39  ;;  %v1640_v46 = vmul.u32.u64.high %v1597_v47, %v338_v39, %v1639_v43  ;;  %v1648_v57 = vand.u32 31, %v1609_v59 }
  0xbe   :  { %v1643_v48 = vmul.u32.u64.low %v1597_v47, %v334_v34  ;;  %v1644_v54 = vmul.u32.u64.high %v1597_v47, %v334_v34, %v1643_v48  ;;  %v614_v55 = vshrl.u32 %v1559_v50, 5  ;;  %v629_v61 = vor.u32 %v628_v49, %v627_v45 }
  0xbf   :  { %v632_v63 = vor.u32 %v1606_v53, %v630_v32  ;;  %v619_v1 = vshrl.u32 %v1482_v60, %v1580_v26  ;;  %v330_v2 = vsel %vm324_vm12, %v327_v33, %v329_v42  ;;  %v618_v4 = vshll.u32 %v1481_v58, %v1568_v62 }
  0xc0   :  { %v621_v5 = vshll.u32 %v1482_v60, %v1568_v62  ;;  %v622_v7 = vshrl.u32 %v1483_v0, %v1580_v26  ;;  %v151_v51 = vsub.s32 0, %v1635_v41  ;;  %vm348_vm13 = vc.u32 %v1640_v46, %v1643_v48 }
  0xc1   :  { %v609_v50 = vor.u32 8388608, %v1593_v44  ;;  %v349_v45 = vadd.s32 1, %v1644_v54  ;;  %v1667_v49 = vsub.s32 32, %v1648_v57  ;;  %v620_v53 = vor.u32 %v619_v1, %v618_v4 }
  0xc2   :  { %v623_v56 = vor.u32 %v622_v7, %v621_v5  ;;  %vm636_vm14 = vcmp.lt.s32.totalorder %v614_v55, 4  ;;  %v346_v8 = vmul.u32 %v1597_v47, %v330_v2  ;;  %v624_v10 = vshll.u32 %v1483_v0, %v1568_v62 }
  0xc3   :  { %v625_v11 = vshrl.u32 %v1484_v3, %v1580_v26  ;;  %v642_v12 = vsel %vm636_vm14, %v629_v61, 920167782  ;;  %v646_v44 = vsel %vm636_vm14, %v632_v63, 1326507024  ;;  %v350_v13 = vsel %vm348_vm13, %v349_v45, %v1644_v54 }
  0xc4   :  { %v617_v14 = vshrl.u32 %v1481_v58, %v1580_v26  ;;  %v1237_v15 = vmin.u32 %v151_v51, %v1635_v41  ;;  %v351_v16 = vadd.s32 %v350_v13, %v346_v8  ;;  %vm633_vm15 = vcmp.lt.s32.totalorder %v614_v55, 1 }
  0xc5   :  { %v626_v17 = vor.u32 %v625_v11, %v624_v10  ;;  %v839_v62 = vshrl.u32 %v1486_v9, %v1667_v49  ;;  %vm634_vm0 = vcmp.lt.s32.totalorder %v614_v55, 2  ;;  %vm635_vm1 = vcmp.lt.s32.totalorder %v614_v55, 3 }
  0xc6   :  { %v641_v47 = vsel %vm633_vm15, %v620_v53, %v623_v56  ;;  %v352_v18 = vadd.s32 536870912, %v351_v16  ;;  %v647_v22 = vsel %vm635_vm1, %v629_v61, %v646_v44  ;;  %v1685_v23 = vshrl.u32 %v1609_v59, 5 }
  0xc7   :  { %v638_v20 = vsel %vm636_vm14, %v626_v17, 2102212464  ;;  %v643_v21 = vsel %vm635_vm1, %v626_v17, %v642_v12  ;;  %v645_v24 = vsel %vm633_vm15, %v623_v56, %v626_v17  ;;  %v649_v25 = vshll.u32 %v609_v50, 8 }
  0xc8   :  { %v644_v26 = vsel %vm634_vm0, %v641_v47, %v643_v21  ;;  %v153_v30 = vclz %v1237_v15  ;;  %v1689_v31 = vshrl.u32 %v352_v18, 30  ;;  %v838_v9 = vshll.u32 %v1485_v6, %v1648_v57 }
  0xc9   :  { %v637_v32 = vsel %vm633_vm15, %v617_v14, %v620_v53  ;;  %v639_v33 = vsel %vm635_vm1, %v623_v56, %v638_v20  ;;  %v648_v34 = vsel %vm634_vm0, %v645_v24, %v647_v22  ;;  %v836_v43 = vshrl.u32 %v1485_v6, %v1667_v49 }
  0xca   :  { %v1695_v39 = vmul.u32.u64.low %v649_v25, %v644_v26  ;;  %v1696_v42 = vmul.u32.u64.high %v649_v25, %v644_v26, %v1695_v39  ;;  %v354_v59 = vshll.u32 %v1689_v31, 30  ;;  %v840_v54 = vor.u32 %v839_v62, %v838_v9 }
  0xcb   :  { %v809_v61 = vand.u32 2147483647, %v1550_v37  ;;  %v1703_v63 = vmul.u32.u64.low %v649_v25, %v648_v34  ;;  %v1704_v1 = vmul.u32.u64.high %v649_v25, %v648_v34, %v1703_v63  ;;  %v835_v4 = vshll.u32 %v1484_v3, %v1648_v57 }
  0xcc   :  { %v1706_v2 = vsub.s32 %v351_v16, %v354_v59  ;;  %vm844_vm2 = vcmp.lt.s32.totalorder %v1685_v23, 4  ;;  %v640_v5 = vsel %vm634_vm0, %v637_v32, %v639_v33  ;;  %v1238_v7 = vadd.s32 4294967294, %v153_v30 }
  0xcd   :  { %v659_v51 = vadd.s32 1, %v1696_v42  ;;  %v827_v6 = vshrl.u32 %v1482_v60, %v1667_v49  ;;  %v830_v50 = vshrl.u32 %v1483_v0, %v1667_v49  ;;  %v837_v53 = vor.u32 %v836_v43, %v835_v4 }
  0xce   :  { %v357_v45 = vsub.s32 0, %v1706_v2  ;;  %v854_v56 = vsel %vm844_vm2, %v840_v54, 1326507024  ;;  %v816_v8 = vand.u32 8388607, %v809_v61  ;;  %v656_v55 = vmul.u32 %v649_v25, %v640_v5 }
  0xcf   :  { %vm658_vm3 = vc.u32 %v1704_v1, %v1695_v39  ;;  %v826_v10 = vshll.u32 %v1481_v58, %v1648_v57  ;;  %v829_v11 = vshll.u32 %v1482_v60, %v1648_v57  ;;  %v832_v13 = vshll.u32 %v1483_v0, %v1648_v57 }
  0xd0   :  { %v1245_v12 = vmin.u32 %v357_v45, %v1706_v2  ;;  %v660_v44 = vsel %vm658_vm3, %v659_v51, %v1696_v42  ;;  %v833_v14 = vshrl.u32 %v1484_v3, %v1667_v49  ;;  %vm1239_vm4 = vcmp.lt.s32.totalorder %v1238_v7, 0 }
  0xd1   :  { %v661_v15 = vadd.s32 %v660_v44, %v656_v55  ;;  %v828_v16 = vor.u32 %v827_v6, %v826_v10  ;;  %v831_v17 = vor.u32 %v830_v50, %v829_v11  ;;  %v850_v47 = vsel %vm844_vm2, %v837_v53, 920167782 }
  0xd2   :  { %v359_v62 = vclz %v1245_v12  ;;  %v834_v18 = vor.u32 %v833_v14, %v832_v13  ;;  %vm843_vm5 = vcmp.lt.s32.totalorder %v1685_v23, 3  ;;  %v817_v20 = vor.u32 8388608, %v816_v8 }
  0xd3   :  { %v662_v60 = vadd.s32 536870912, %v661_v15  ;;  %v855_v21 = vsel %vm843_vm5, %v837_v53, %v854_v56  ;;  %v156_v0 = vsel %vm1239_vm4, 0, %v1238_v7  ;;  %vm841_vm6 = vcmp.lt.s32.totalorder %v1685_v23, 1 }
  0xd4   :  { %v1246_v57 = vadd.s32 4294967294, %v359_v62  ;;  %vm842_vm7 = vcmp.lt.s32.totalorder %v1685_v23, 2  ;;  %v849_v22 = vsel %vm841_vm6, %v828_v16, %v831_v17  ;;  %v851_v26 = vsel %vm843_vm5, %v834_v18, %v850_v47 }
  0xd5   :  { %v1741_v3 = vshrl.u32 %v662_v60, 30  ;;  %v853_v24 = vsel %vm841_vm6, %v831_v17, %v834_v18  ;;  %v857_v32 = vshll.u32 %v817_v20, 8  ;;  %v161_v33 = vsub.s32 4294967266, %v156_v0 }
  0xd6   :  { %vm1247_vm8 = vcmp.lt.s32.totalorder %v1246_v57, 0  ;;  %v856_v25 = vsel %vm842_vm7, %v853_v24, %v855_v21  ;;  %v825_v34 = vshrl.u32 %v1481_v58, %v1667_v49  ;;  %v846_v42 = vsel %vm844_vm2, %v834_v18, 2102212464 }
  0xd7   :  { %v362_v30 = vsel %vm1247_vm8, 0, %v1246_v57  ;;  %v664_v9 = vshll.u32 %v1741_v3, 30  ;;  %v852_v59 = vsel %vm842_vm7, %v849_v22, %v851_v26  ;;  %v847_v51 = vsel %vm843_vm5, %v831_v17, %v846_v42 }
  0xd8   :  { %v367_v43 = vsub.s32 4294967266, %v362_v30  ;;  %v1758_v63 = vmul.u32.u64.low %v857_v32, %v856_v25  ;;  %v1759_v4 = vmul.u32.u64.high %v857_v32, %v856_v25, %v1758_v63  ;;  %v845_v5 = vsel %vm841_vm6, %v825_v34, %v828_v16 }
  0xd9   :  { %v665_v54 = vsub.s32 %v661_v15, %v664_v9  ;;  %v1765_v6 = vmul.u32.u64.low %v857_v32, %v852_v59  ;;  %v1766_v58 = vmul.u32.u64.high %v857_v32, %v852_v59, %v1765_v6  ;;  %v162_v49 = vadd.s32 127, %v161_v33 }
  0xda   :  { %v368_v50 = vadd.s32 127, %v367_v43  ;;  %v157_v53 = vsub.s32 32, %v156_v0  ;;  %v848_v56 = vsel %vm842_vm7, %v845_v5, %v847_v51  ;;  %v363_v8 = vsub.s32 32, %v362_v30 }
  0xdb   :  { %v667_v7 = vsub.s32 0, %v665_v54  ;;  %vm866_vm9 = vc.u32 %v1759_v4, %v1765_v6  ;;  %v141_v10 = vadd.s32 %v1587_v38, %v1584_v36  ;;  %v163_v11 = vshll.u32 %v162_v49, 23 }
  0xdc   :  { %v867_v12 = vadd.s32 1, %v1766_v58  ;;  %v347_v44 = vadd.s32 %v1643_v48, %v1640_v46  ;;  %v369_v13 = vshll.u32 %v368_v50, 23  ;;  %v864_v15 = vmul.u32 %v857_v32, %v848_v56 }
  0xdd   :  { %v1257_v45 = vmin.u32 %v667_v7, %v665_v54  ;;  %v159_v16 = vshrl.u32 %v141_v10, %v157_v53  ;;  %v158_v17 = vshll.u32 %v1635_v41, %v156_v0  ;;  %v164_v18 = vor.u32 4788187, %v163_v11 }
  0xde   :  { %v868_v23 = vsel %vm866_vm9, %v867_v12, %v1766_v58  ;;  %v365_v62 = vshrl.u32 %v347_v44, %v363_v8  ;;  %v364_v36 = vshll.u32 %v1706_v2, %v362_v30  ;;  %v657_v38 = vadd.s32 %v1695_v39, %v1704_v1 }
  0xdf   :  { %v669_v55 = vclz %v1257_v45  ;;  %v869_v47 = vadd.s32 %v868_v23, %v864_v15  ;;  %v370_v20 = vor.u32 4788187, %v369_v13  ;;  %v160_v57 = vor.u32 %v159_v16, %v158_v17 }
  0xe0   :  { %v366_v22 = vor.u32 %v365_v62, %v364_v36  ;;  %v165_v41 = vand.u32 2147483647, %v164_v18  ;;  %vm87_vm11 = vcmp.lt.s32.totalorder %v1539_v27, 0  ;;  %vm293_vm12 = vcmp.lt.s32.totalorder %v1546_v35, 0 }
  0xe1   :  { %v1258_v14 = vadd.s32 4294967294, %v669_v55  ;;  %v870_v21 = vadd.s32 536870912, %v869_v47  ;;  %v371_v0 = vand.u32 2147483647, %v370_v20  ;;  %v167_v30 = vcvt.s32.f32 %v160_v57 }
  0xe2   :  { %v373_v33 = vcvt.s32.f32 %v366_v22  ;;  %vm1794_vm14 = vcmp.le.f32.partialorder %v85_v29, 0.7853982  ;;  %vm1800_vm15 = vcmp.le.f32.partialorder %v291_v40, 0.7853982  ;;  %v865_v11 = vadd.s32 %v1765_v6, %v1759_v4 }
  0xe3   :  { %vm1259_vm10 = vcmp.lt.s32.totalorder %v1258_v14, 0  ;;  %v1783_v25 = vshrl.u32 %v870_v21, 30  ;;  %v168_v42 = vmul.f32 %v167_v30, %v165_v41  ;;  %vm603_vm0 = vcmp.lt.s32.totalorder %v1541_v28, 0 }
  0xe4   :  { %v672_v60 = vsel %vm1259_vm10, 0, %v1258_v14  ;;  %v374_v59 = vmul.f32 %v373_v33, %v371_v0  ;;  %vm1817_vm1 = vcmp.le.f32.partialorder %v601_v52, 0.7853982  ;;  %v687_v36 = vsub.s32 4, %v1741_v3 }
  0xe5   :  { %v673_v46 = vsub.s32 32, %v672_v60  ;;  %v677_v48 = vsub.s32 4294967266, %v672_v60  ;;  %v674_v9 = vshll.u32 %v665_v54, %v672_v60  ;;  %v872_v2 = vshll.u32 %v1783_v25, 30 }
  0xe6   :  { %v169_v51 = vxor.u32 2147483648, %v168_v42  ;;  %v375_v58 = vxor.u32 2147483648, %v374_v59  ;;  %v688_v20 = vsel %vm603_vm0, %v687_v36, %v1741_v3  ;;  %vm811_vm2 = vcmp.lt.s32.totalorder %v1550_v37, 0  ;;  %v1406_v36 = vld [vmem:[#allocation4 + $0x8] sm:$0xff]  }
  0xe7   :  { %v675_v26 = vshrl.u32 %v657_v38, %v673_v46  ;;  %v678_v24 = vadd.s32 127, %v677_v48  ;;  %v873_v34 = vsub.s32 %v869_v47, %v872_v2  ;;  %v377_v38 = vsub.s32 4, %v1689_v31 }
  0xe8   :  { %v170_v54 = vsel %vm87_vm11, %v169_v51, %v168_v42  ;;  %v376_v53 = vsel %vm293_vm12, %v375_v58, %v374_v59  ;;  %v895_v46 = vsub.s32 4, %v1783_v25  ;;  %v171_v48 = vsub.s32 4, %v1623_v19 }
  0xe9   :  { %v679_v32 = vshll.u32 %v678_v24, 23  ;;  %v676_v39 = vor.u32 %v675_v26, %v674_v9  ;;  %v875_v63 = vsub.s32 0, %v873_v34  ;;  %v379_v13 = vsel %vm1800_vm15, %v1546_v35, %v376_v53 }
  0xea   :  { %v173_v29 = vsel %vm1794_vm14, %v1539_v27, %v170_v54  ;;  %vm1834_vm3 = vcmp.le.f32.partialorder %v809_v61, 0.7853982  ;;  %v378_v3 = vsel %vm293_vm12, %v377_v38, %v1689_v31  ;;  %v690_v26 = vsel %vm1817_vm1, 0, %v688_v20 }
  0xeb   :  { %v680_v1 = vor.u32 4788187, %v679_v32  ;;  %v683_v5 = vcvt.s32.f32 %v676_v39  ;;  %v1265_v7 = vmin.u32 %v875_v63, %v873_v34  ;;  %1408 = vcosq.f32 %v173_v29 }
  0xec   :  { %1410 = vcosq.f32 %v379_v13  ;;  %v896_v41 = vsel %vm811_vm2, %v895_v46, %v1783_v25  ;;  %v172_v61 = vsel %vm87_vm11, %v171_v48, %v1623_v19  ;;  %v380_v9 = vsel %vm1800_vm15, 0, %v378_v3 }
  0xed   :  { %v681_v43 = vand.u32 2147483647, %v680_v1  ;;  %v877_v50 = vclz %v1265_v7  ;;  %1412 = vsinq.f32 %v379_v13  ;;  %v694_v2 = vadd.s32 3, %v690_v26 }
  0xee   :  { %1414 = vsinq.f32 %v173_v29  ;;  %v898_v31 = vsel %vm1834_vm3, 0, %v896_v41  ;;  %v174_v33 = vsel %vm1794_vm14, 0, %v172_v61  ;;  %v384_v25 = vand.u32 3, %v380_v9 }
  0xef   :  { %v684_v49 = vmul.f32 %v683_v5, %v681_v43  ;;  %v1266_v45 = vadd.s32 4294967294, %v877_v50  ;;  %v695_v59 = vand.u32 3, %v694_v2  ;;  %v902_v19 = vadd.s32 3, %v898_v31 }
  0xf0   :  { %v178_v43 = vand.u32 3, %v174_v33  ;;  %vm386_vm4 = vcmp.eq.s32.totalorder %v384_v25, 0  ;;  %vm389_vm5 = vcmp.eq.s32.totalorder %v384_v25, 2  ;;  %vm385_vm10 = vcmp.lt.s32.totalorder %v384_v25, 2 }
  0xf1   :  { %v685_v56 = vxor.u32 2147483648, %v684_v49  ;;  %vm1267_vm13 = vcmp.lt.s32.totalorder %v1266_v45, 0  ;;  %vm697_vm6 = vcmp.eq.s32.totalorder %v695_v59, 0  ;;  %v903_v50 = vand.u32 3, %v902_v19 }
  0xf2   :  { %v880_v8 = vsel %vm1267_vm13, 0, %v1266_v45  ;;  %vm180_vm7 = vcmp.eq.s32.totalorder %v178_v43, 0  ;;  %vm183_vm8 = vcmp.eq.s32.totalorder %v178_v43, 2  ;;  %vm700_vm9 = vcmp.eq.s32.totalorder %v695_v59, 2 }
  0xf3   :  { %v881_v12 = vsub.s32 32, %v880_v8  ;;  %v885_v44 = vsub.s32 4294967266, %v880_v8  ;;  %v686_v40 = vsel %vm603_vm0, %v685_v56, %v684_v49  ;;  %v882_v14 = vshll.u32 %v873_v34, %v880_v8 }
  0xf4   :  { %v689_v17 = vsel %vm1817_vm1, %v1541_v28, %v686_v40  ;;  %vm696_vm11 = vcmp.lt.s32.totalorder %v695_v59, 2  ;;  %vm179_vm12 = vcmp.lt.s32.totalorder %v178_v43, 2  ;;  %vm908_vm13 = vcmp.eq.s32.totalorder %v903_v50, 2 }
  0xf5   :  { %v883_v15 = vshrl.u32 %v865_v11, %v881_v12  ;;  %v886_v16 = vadd.s32 127, %v885_v44  ;;  %1416 = vcosq.f32 %v689_v17  ;;  %vm383_vm14 = vweird.f32 %v1546_v35  ;;  %v1400_v35 = vld [vmem:[#allocation4 + $0x38] sm:$0xff]  }
  0xf6   :  { %1418 = vsinq.f32 %v689_v17  ;;  %vm905_vm15 = vcmp.eq.s32.totalorder %v903_v50, 0  ;;  %vm904_vm0 = vcmp.lt.s32.totalorder %v903_v50, 2  ;;  %vm177_vm1 = vweird.f32 %v1539_v27  ;;  %v1402_v27 = vld [vmem:[#allocation4 + $0x28] sm:$0xff]  }
  0xf7   :  { %v884_v6 = vor.u32 %v883_v15, %v882_v14  ;;  %v887_v23 = vshll.u32 %v886_v16, 23 }
  0xf8   :  { %v1409_v24 = vpop.eup %1408 }
  0xf9   :  { %v888_v62 = vor.u32 4788187, %v887_v23  ;;  %v891_v18 = vcvt.s32.f32 %v884_v6  ;;  %v1411_v0 = vpop.eup %1410  ;;  %v184_v5 = vxor.u32 2147483648, %v1409_v24 }
  0xfa   :  { %v1413_v32 = vpop.eup %1412  ;;  %v390_v42 = vxor.u32 2147483648, %v1411_v0 }
  0xfb   :  { %v889_v47 = vand.u32 2147483647, %v888_v62  ;;  %v1415_v30 = vpop.eup %1414  ;;  %v387_v34 = vxor.u32 2147483648, %v1413_v32  ;;  %v1487_v62 = vmov 0.0  }
  0xfc   :  { %v181_v63 = vxor.u32 2147483648, %v1415_v30  ;;  %v391_v49 = vsel %vm389_vm5, %v390_v42, %v1413_v32  ;;  %v185_v54 = vsel %vm183_vm8, %v184_v5, %v1415_v30  ;;  %1334 = vmatprep.subr.bf16.mxu1 %v1487_v62 }
  0xfd   :  { %v892_v52 = vmul.f32 %v891_v18, %v889_v47  ;;  %v388_v58 = vsel %vm386_vm4, %v1411_v0, %v387_v34  ;;  %1335 = vmatpush3.bf16.msra.mxu1 %v1400_v35  ;;  %v1401_v47 = vld [vmem:[#allocation4 + $0x30] sm:$0xff]   ;;  %vm1488_vm4 = vmmov 0   ;;  %v1285_v34 = vld [vmem:[%s1874_s5] ss:$0 sm:$0xff] }
  0xfe   :  { %v182_v45 = vsel %vm180_vm7, %v1409_v24, %v181_v63  ;;  %v392_v55 = vsel %vm385_vm10, %v388_v58, %v391_v49  ;;  %1336 = vmatprep.subr.bf16.mxu1 %v1487_v62  ;;  %1350 = vmatprep.mubr.msk.bf16.mxu1 %vm1488_vm4, %v1487_v62  ;;  %v1405_v18 = vld [vmem:[#allocation4 + $0x10] sm:$0xff]  }
  0xff   :  { %v893_v60 = vxor.u32 2147483648, %v892_v52  ;;  %v186_v44 = vsel %vm179_vm12, %v182_v45, %v185_v54  ;;  %v393_v40 = vsel %vm383_vm14, nan, %v392_v55 }
 0x100   :  { %v187_v16 = vsel %vm177_vm1, nan, %v186_v44 }
 0x101   :  { %v894_v57 = vsel %vm811_vm2, %v893_v60, %v892_v52  ;;  %vm693_vm2 = vweird.f32 %v1541_v28  ;;  %v917_v23 = vpack.c.bf16 %v393_v40, %v187_v16  ;;  %1337 = vmatpush3.bf16.msra.mxu1 %v1401_v47  ;;  %v1403_v28 = vld [vmem:[#allocation4 + $0x20] sm:$0xff]  }
 0x102   :  { %v897_v22 = vsel %vm1834_vm3, %v1550_v37, %v894_v57  ;;  %v1417_v39 = vpop.eup %1416  ;;  %vm901_vm3 = vweird.f32 %v1550_v37  ;;  %1338 = vmatprep.subr.bf16.mxu1 %v1487_v62  ;;  %v1404_v37 = vld [vmem:[#allocation4 + $0x18] sm:$0xff]   ;;  %v1407_v52 = vld [vmem:[#allocation4] sm:$0xff]  }
 0x103   :  { %1420 = vcosq.f32 %v897_v22  ;;  %v1419_v1 = vpop.eup %1418  ;;  %v701_v51 = vxor.u32 2147483648, %v1417_v39  ;;  %v1268_v60 = vld [vmem:[%s1872_s3] ss:$0 sm:$0xff] }
 0x104   :  { %1422 = vsinq.f32 %v897_v22  ;;  %v698_v7 = vxor.u32 2147483648, %v1419_v1 }
 0x105   :  { %v702_v8 = vsel %vm700_vm9, %v701_v51, %v1419_v1  ;;  %1339 = vmatpush3.bf16.msra.mxu1 %v1402_v27 }
 0x106   :  { %v699_v56 = vsel %vm697_vm6, %v1417_v39, %v698_v7  ;;  %1340 = vmatprep.subr.bf16.mxu1 %v1487_v62 }
 0x107   :  { %v703_v13 = vsel %vm696_vm11, %v699_v56, %v702_v8 }
 0x108   :  { %v704_v4 = vsel %vm693_vm2, nan, %v703_v13 }
 0x109   :  { %1341 = vmatpush3.bf16.msra.mxu1 %v1403_v28 }
 0x10a   :  { %1342 = vmatprep.subr.bf16.mxu1 %v1487_v62 }
 0x10d   :  { %1343 = vmatpush3.bf16.msra.mxu1 %v1404_v37 }
 0x10e   :  { %1344 = vmatprep.subr.bf16.mxu1 %v1487_v62 }
 0x110   :  { %v1421_v53 = vpop.eup %1420 }
 0x111   :  { %v1423_v10 = vpop.eup %1422  ;;  %v909_v11 = vxor.u32 2147483648, %v1421_v53  ;;  %1345 = vmatpush3.bf16.msra.mxu1 %v1405_v18 }
 0x112   :  { %v906_v12 = vxor.u32 2147483648, %v1423_v10  ;;  %1346 = vmatprep.subr.bf16.mxu1 %v1487_v62 }
 0x113   :  { %v910_v29 = vsel %vm908_vm13, %v909_v11, %v1423_v10 }
 0x114   :  { %v907_v14 = vsel %vm905_vm15, %v1421_v53, %v906_v12 }
 0x115   :  { %v911_v15 = vsel %vm904_vm0, %v907_v14, %v910_v29  ;;  %1347 = vmatpush3.bf16.msra.mxu1 %v1406_v36 }
 0x116   :  { %v912_v6 = vsel %vm901_vm3, nan, %v911_v15  ;;  %1348 = vmatprep.subr.bf16.mxu1 %v1487_v62 }
 0x117   :  { %v918_v17 = vpack.c.bf16 %v912_v6, %v704_v4 }
 0x119   :  { %1086 = vmatprep.mubr.bf16.mxu0 %v918_v17  ;;  %1349 = vmatpush3.bf16.msra.mxu1 %v1407_v52 }
 0x11a   :  { %1087 = vmatmul.mubr.bf16.vlgmr.msra.gmra.mxu0 %v917_v23 }
 0x1da   :  { %v1319_v38 = vpop.f32.mrf.mxu0 }
 0x1dc   :  { %v1320_v20 = vpop.f32.mrf.mxu0 }
 0x1dd   :  { %v1321_v46 = vadd.f32 %v1320_v20, %v1319_v38 }
 0x1de   :  { %v1322_v48 = vpop.f32.mrf.mxu0 }
 0x1df   :  { %v1089_v21 = vadd.f32 %v1321_v46, %v1268_v60 }
 0x1e0   :  { %v1323_v57 = vpop.f32.mrf.mxu0 }
 0x1e1   :  { %v1095_v22 = vsub.f32 0.0, %v1089_v21  ;;  %v1324_v3 = vadd.f32 %v1323_v57, %v1322_v48 }
 0x1e3   :  { %v1097_v26 = vmul.f32 1.442695, %v1095_v22  ;;  %v1092_v24 = vadd.f32 %v1324_v3, %v1268_v60 }
 0x1e5   :  { %1424 = vpow2.f32 %v1097_v26  ;;  %v1096_v41 = vsub.f32 0.0, %v1092_v24 }
 0x1e7   :  { %v1099_v61 = vmul.f32 1.442695, %v1096_v41 }
 0x1e9   :  { %1426 = vpow2.f32 %v1099_v61 }
 0x1f2   :  { %v1425_v0 = vpop.eup %1424 }
 0x1f3   :  { %v1101_v9 = vadd.f32 1.0, %v1425_v0 }
 0x1f5   :  { %1428 = vrcp.f32 %v1101_v9 }
 0x1f6   :  { %v1427_v32 = vpop.eup %1426 }
 0x1f7   :  { %v1102_v2 = vadd.f32 1.0, %v1427_v32 }
 0x1f9   :  { %1430 = vrcp.f32 %v1102_v2 }
 0x202   :  { %v1429_v30 = vpop.eup %1428 }
 0x203   :  { %v1105_v33 = vmul.f32 %v1429_v30, %v1089_v21 }
 0x206   :  { %v1431_v31 = vpop.eup %1430 }
 0x207   :  { %v1106_v39 = vmul.f32 %v1431_v31, %v1092_v24 }
 0x209   :  { %v1107_v25 = vpack.c.bf16 %v1106_v39, %v1105_v33 }
 0x20b   :  { %1351 = vmatmul.mubr.bf16.vlgmr.msra.gmra.mxu1 %v1107_v25 }
 0x2cb   :  { %v1213_v1 = vpop.f32.mrf.mxu1 }
 0x2cc   :  { %v1214_v19 = vadd.f32 %v1285_v34, %v1213_v1 }
 0x2cd   :  { %v1352_v42 = vpop.f32.mrf.mxu1 }
 0x2cf   :  { %v1216_v59 = vpop.f32.mrf.mxu1 }
 0x2d0   :  { %v1217_v43 = vadd.f32 %v1285_v34, %v1216_v59 }
 0x2d1   :  { %v1353_v63 = vpop.f32.mrf.mxu1 }
 0x2d2   :  { %v1301_v5 = vpack.c.bf16 %v1217_v43, %v1214_v19 }
 0x2d4   :  { %1302 = vst [vmem:[%s1875_s6] sm:$0xff] %v1301_v5  }
 0x2d5   :  { %1234 = vsyncpa [#allocation3], 1 }
 0x2d6   :  { %1235 = vsyncpa [#allocation5], 1 }

</bundles_post_ra>
